<compile_context>
chip_gen: v5e
topology: v5e:2x2
jax: 0.10.0
libtpu: 0.0.40
codegen_flags: <defaults>
</compile_context>

<pallas_src>
import math

import jax
import jax.numpy as jnp
from jax.experimental import pallas as pl
from jax.experimental.pallas import tpu as pltpu


def _build_pe_table(d_model: int, max_len: int = 5000,
                    dtype=jnp.float32) -> jnp.ndarray:
    """Sinusoidal positional-encoding buffer, shape (max_len, d_model).

    Build once (in the model/activation dtype) and reuse across forward calls so
    no per-call cast/slice pass over HBM is needed.
    """
    position = jnp.arange(0, max_len, dtype=jnp.float32)[:, None]              # (max_len, 1)
    div_term = jnp.exp(
        jnp.arange(0, d_model, 2, dtype=jnp.float32) * (-math.log(10000.0) / d_model)
    )                                                                           # (ceil(d/2),)
    angles = position * div_term                                                # (max_len, ceil(d/2))
    pe = jnp.zeros((max_len, d_model), dtype=jnp.float32)
    pe = pe.at[:, 0::2].set(jnp.sin(angles))
    pe = pe.at[:, 1::2].set(jnp.cos(angles)[:, : d_model // 2])
    return pe.astype(dtype)


def _pos_enc_kernel(x_ref, pe_ref, o_ref):
    # Squeezed batch dim: all refs are (TS, D). Pure VPU add; if pe is a wider
    # dtype than x (PyTorch-style f32 buffer + bf16 activations) the promotion
    # happens in VMEM and the result is cast back on store.
    o_ref[...] = (x_ref[...] + pe_ref[...]).astype(o_ref.dtype)


def _pick_seq_tile(S: int, D: int, itemsize: int, target_bytes: int = 4 << 20) -> int:
    """Seq-tile rows for ~4 MiB blocks.

    No divisibility requirement on S (the grid uses cdiv + masked last tile).
    Multiples of 16 keep bf16 sublane packing dense. Small inputs use a single
    full-extent block (always a legal block shape).
    """
    if S * D * itemsize <= target_bytes:
        return S
    ts = (target_bytes // (D * itemsize)) // 16 * 16
    return int(max(16, min(ts, 1024)))


def _pos_enc_call(x: jnp.ndarray, pe_table: jnp.ndarray) -> jnp.ndarray:
    """x: (B, S, D); pe_table: (max_len, D). Returns x + pe[:S] broadcast over B."""
    B, S, D = x.shape
    max_len = pe_table.shape[0]
    assert S <= max_len, "sequence length exceeds positional-encoding max_len"

    itemsize = jnp.dtype(x.dtype).itemsize
    TS = _pick_seq_tile(S, D, itemsize)
    num_s_tiles = pl.cdiv(S, TS)

    # pe is normally passed whole; the index_map picks the rows, so no per-call
    # slice copy. Edge case: TS == S and S not a multiple of 8 -> slice so the
    # full-extent block-shape rule applies to pe as well.
    pe_in = pe_table if TS % 8 == 0 else pe_table[:S, :]

    # Mem-bound op: read x, write out, read pe (once).
    cost = pl.CostEstimate(
        flops=B * S * D,
        transcendentals=0,
        bytes_accessed=2 * B * S * D * itemsize
        + S * D * jnp.dtype(pe_table.dtype).itemsize,
    )

    # NOTE: keep d_model a multiple of 128 in production (lane-dense stores);
    # non-128 D lowers to masked vst.msk on the store path.
    return pl.pallas_call(
        _pos_enc_kernel,
        out_shape=jax.ShapeDtypeStruct((B, S, D), x.dtype),
        grid_spec=pltpu.PrefetchScalarGridSpec(
            num_scalar_prefetch=0,
            # Grid: (seq tiles, batch). Batch is innermost and pe's block index is
            # independent of it, so the pe tile stays resident across the batch
            # loop and pe is streamed from HBM exactly once.
            grid=(num_s_tiles, B),
            in_specs=[
                pl.BlockSpec((pl.Squeezed(), TS, D), lambda s, b: (b, s, 0)),  # x
                pl.BlockSpec((TS, D), lambda s, b: (s, 0)),                    # pe
            ],
            out_specs=pl.BlockSpec((pl.Squeezed(), TS, D), lambda s, b: (b, s, 0)),
        ),
        compiler_params=pltpu.CompilerParams(
            # No reduction axis: both parallel -> megacore sharding on v7x.
            dimension_semantics=("parallel", "parallel"),
            # Headroom for 6 x ~4 MiB double-buffered tiles on every generation
            # (v5e's scoped default is only 16 MiB; v7x physical is 64 MiB).
            vmem_limit_bytes=48 << 20,
        ),
        input_output_aliases={0: 0},   # output reuses x's (donated) HBM buffer
        cost_estimate=cost,
    )(x, pe_in)


# Public entry point: donate x so input_output_aliases is a real in-place update
# rather than a defensive copy. Callers must not read x after this call.
positional_encoding = jax.jit(_pos_enc_call, donate_argnums=(0,))


if __name__ == "__main__":
    # Small shapes consistent with the module's forward: (batch, seq, d_model).
    B, S, D = 2, 8, 32
    max_len = 64  # module default is 5000; small max_len keeps the demo tiny

    key = jax.random.PRNGKey(0)
    x = jax.random.normal(key, (B, S, D), dtype=jnp.float32)

    pe_table = _build_pe_table(D, max_len, dtype=x.dtype)

    # Reference (pure JAX) computed and materialized BEFORE the kernel call:
    # the kernel donates x's buffer, so x must not be read afterwards.
    ref = jax.block_until_ready(x + pe_table[None, :S, :])

    out = positional_encoding(x, pe_table)
    out = jax.block_until_ready(out)

    assert out.shape == (B, S, D)
    assert jnp.allclose(out, ref, atol=1e-6), "mismatch vs reference"

    print("KERNEL_OK")
</pallas_src>

<mosaic_0001>
module attributes {stable_mosaic.version = 11 : i64} {
  func.func @_pos_enc_kernel(%arg0: i32, %arg1: i32, %arg2: memref<1x8x32xf32, #tpu.memory_space<vmem>>, %arg3: memref<8x32xf32, #tpu.memory_space<vmem>>, %arg4: memref<1x8x32xf32, #tpu.memory_space<vmem>>) attributes {dimension_semantics = [#tpu.dimension_semantics<parallel>, #tpu.dimension_semantics<parallel>], iteration_bounds = array<i64: 1, 2>, scalar_prefetch = 0 : i64, scratch_operands = 0 : i64, tpu.core_type = #tpu.core_type<tc>, window_params = [{transform_indices = @transform_0, window_bounds = array<i64: 1, 8, 32>}, {transform_indices = @transform_1, window_bounds = array<i64: 8, 32>}, {transform_indices = @transform_2, window_bounds = array<i64: 1, 8, 32>}]} {
    %c0 = arith.constant 0 : index
    %c0_0 = arith.constant 0 : index
    %c0_1 = arith.constant 0 : index
    %0 = vector.load %arg2[%c0, %c0_0, %c0_1] : memref<1x8x32xf32, #tpu.memory_space<vmem>>, vector<1x8x32xf32>
    %1 = vector.shape_cast %0 : vector<1x8x32xf32> to vector<8x32xf32>
    %c0_2 = arith.constant 0 : index
    %c0_3 = arith.constant 0 : index
    %2 = vector.load %arg3[%c0_2, %c0_3] : memref<8x32xf32, #tpu.memory_space<vmem>>, vector<8x32xf32>
    %3 = arith.addf %1, %2 : vector<8x32xf32>
    %c0_4 = arith.constant 0 : index
    %c0_5 = arith.constant 0 : index
    %c0_6 = arith.constant 0 : index
    %4 = vector.load %arg4[%c0_4, %c0_5, %c0_6] : memref<1x8x32xf32, #tpu.memory_space<vmem>>, vector<1x8x32xf32>
    %5 = vector.shape_cast %4 : vector<1x8x32xf32> to vector<8x32xf32>
    %6 = vector.shape_cast %3 : vector<8x32xf32> to vector<1x8x32xf32>
    tpu.vector_store %arg4[%c0_4, %c0_5, %c0_6], %6 {strides = array<i32>} : memref<1x8x32xf32, #tpu.memory_space<vmem>>, vector<1x8x32xf32>,
    return
  }
  func.func @transform_0(%arg0: i32, %arg1: i32) -> (i32, i32, i32) {
    %c0_i32 = arith.constant 0 : i32
    %c0_i32_0 = arith.constant 0 : i32
    return %arg1, %arg0, %c0_i32 : i32, i32, i32
  }
  func.func @transform_1(%arg0: i32, %arg1: i32) -> (i32, i32) {
    %c0_i32 = arith.constant 0 : i32
    %c0_i32_0 = arith.constant 0 : i32
    return %arg0, %c0_i32 : i32, i32
  }
  func.func @transform_2(%arg0: i32, %arg1: i32) -> (i32, i32, i32) {
    %c0_i32 = arith.constant 0 : i32
    %c0_i32_0 = arith.constant 0 : i32
    return %arg1, %arg0, %c0_i32 : i32, i32, i32
  }
}

</mosaic_0001>

<bundles_post_ra>
// kernel: _pos_enc_call.1
= control target key start
LH: loop header
LB: loop body
LE: loop exit
PB: predicated region body
PF: predicated region fallthrough
CT: control target
= control target key end

     0   :  { %7 = vsyncpa [#allocation3], 0  ;;  %s640_s0 = inlined_call_operand.hbm [shape: f32[2,8,32], index: 0, kind: input, shape index: {}, may-alias: {0,2}]   ;;  %s641_s1 = inlined_call_operand.vmem [shape: f32[64,32], index: 1, kind: input, shape index: {}]   ;;  %s642_s2 = inlined_call_operand.hbm [shape: f32[2,8,32], index: 2, kind: output, shape index: {}, may-alias: {0,2}]  }
   0x1   :  { %9 = vsyncpa [#allocation3 + $0x1], 0 }
   0x2   :  { %10 = vsyncpa [#allocation4], 0 }
   0x3   :  { %12 = vsyncpa [#allocation4 + $0x1], 0  ;;  %s517_s9 = smov 0   ;;  %s519_s10 = smov 0  }
   0x4   :  { %s521_s11 = smov 0   ;;  %s523_s12 = smov 0  }
   0x5   :  { %s525_s13 = smov 0   ;;  %s527_s14 = smov 0  }
   0x6 LB: > { %s312_s15 = sadd.s32 4294967295, %s500_s14   ;;  %s313_s16 = sadd.s32 4294967294, %s500_s14   ;;  %s500_s14 = sphi %s527_s14, %s18_s14   ;;  %s496_s13 = sphi %s525_s13, %s651_s13   ;;  %s492_s12 = sphi %s523_s12, %s650_s12   ;;  %s488_s11 = sphi %s521_s11, %s649_s11   ;;  %s484_s10 = sphi %s519_s10, %s648_s10   ;;  %s480_s9 = sphi %s517_s9, %s647_s9  }
   0x7   : > { %s27_s17 = sadd.s32 1, %s496_s13  ;;  %s39_s18 = sadd.s32 1, %s488_s11 }
   0x8   : > { %p28_p0 = scmp.ge.s32.totalorder %s27_s17, 2  ;;  %p46_p1 = scmp.ne.s32.totalorder %s488_s11, %s484_s10 }
   0x9   : > { %p47_p2 = scmp.eq.s32.totalorder %s500_s14, 0  ;;  %p52_p3 = scmp.ne.s32.totalorder %s484_s10, %s480_s9 }
   0xa   : > { %s653_s17 = smov (%p28_p0, %s27_s17), 0  ;;  %p53_p5 = scmp.eq.s32.totalorder %s312_s15, 0 }
   0xb   : > { %p558_p4 = por %p47_p2, %p46_p1  ;;  %s34_s20 = ssub.s32 %s496_s13, %s653_s17 }
   0xc   : > { %p104_p6 = scmp.eq.s32.totalorder %s312_s15, 1  ;;  %p37_p7 = scmp.eq.s32.totalorder %s34_s20, 0 }
   0xd   : > { %p564_p8 = por %p53_p5, %p52_p3  ;;  %p110_p10 = scmp.eq.s32.totalorder %s313_s16, 1 }
   0xe   : > { %p568_p9 = por %p104_p6, %p46_p1  ;;  %p316_p12 = scmp.ge.s32.totalorder %s500_s14, 2 }
   0xf   : > { %s573_s23 = scalar_select %p37_p7, %s488_s11, %s39_s18  }
  0x10   : > { %p575_p11 = por %p110_p10, %p52_p3  ;;  %p338_p13 = scmp.lt.s32.totalorder %s500_s14, 2 }
  0x11   : > { %s137_s25 = sand.u32 1, %s488_s11   ;;  %s318_s27 = sshll.u32 %s496_s13, 3 }
  0x12   : > { %s317_s26 = sshll.u32 %s137_s25, 3  ;;  %s146_s30 = scalar_lea.hbm %s640_s0, %s318_s27 }
  0x13   : > { %s141_s3 = scalar_lea.vmem [#allocation2], %s317_s26  ;;  %s148_s5 = sshll.u32 %s146_s30, 4  ;;  %s149_s5 = int_to_ptr.hbm [resolvable:$true] %s148_s5 }
  0x14   : > { %s150_s4 = sshll.u32 %s141_s3, 4  ;;  %p331_p0 = pnand %p338_p13, %p558_p4  ;;  %s151_s4 = int_to_ptr.vmem [resolvable:$true] %s150_s4 }
  0x15   : > { %p319_p1 = scmp.ge.s32.totalorder %s500_s14, 1  ;;  %p155_p2 = scmp.lt.s32.totalorder %s500_s14, 3 }
  0x16   : > { %s138_s6 = scalar_lea.sflag [#allocation3], %s137_s25 }
  0x17   : > { %333 = dma.hbm_to_vmem [thread:$0]  (!%p331_p0), %s149_s5, 128, %s151_s4, %s138_s6  }
  0x18   : > { %p156_p3 = pnand %p319_p1, %p155_p2 }
  0x19   : > { %s591_s7 = sand.u32 (!%p156_p3), 1, %s484_s10  }
  0x1a   : > { %159 = sbr.rel (%p156_p3) target bundleno = 47 (0x2f), region = 28  ;;  %s320_s8 = sshll.u32 (!%p156_p3), %s591_s7, 3 }
  0x1b   : > { %s162_s15 = scalar_lea.sflag (!%p156_p3), [#allocation3], %s591_s7  ;;  %s165_s16 = scalar_lea.vmem (!%p156_p3), [#allocation2], %s320_s8 }
  0x1f   : > { %471 = dma.done.wait (%p564_p8), %s162_s15, 128  }
  0x20   : > { %473 = vsyncadd (%p564_p8), %s162_s15, 4294967168  ;;  %s323_s18 = sshll.u32 %s492_s12, 3  ;;  %s190_s26 = scalar_lea.vmem [#allocation5], %s320_s8  ;;  %v195_v0 = vld [vmem:[%s165_s16] sm:$0xff]  ;;  %vm198_vm0 = vcmask 261120  }
  0x21   : > { %s212_s25 = scalar_lea.hbm %s642_s2, %s323_s18  ;;  %s214_s27 = sshll.u32 %s190_s26, 4  ;;  %v196_v1 = vld [vmem:[%s641_s1] sm:$0xff]  ;;  %s215_s27 = int_to_ptr.vmem [resolvable:$true] %s214_s27 }
  0x22   : > { %s216_s28 = sshll.u32 %s212_s25, 4  ;;  %v197_v2 = vadd.f32 %v196_v1, %v195_v0  ;;  %s201_s21 = scalar_lea.sflag [#allocation4], %s591_s7  ;;  %s217_s28 = int_to_ptr.hbm [resolvable:$true] %s216_s28 }
  0x23   : > { %s432_s12 = sshra.s32 %s217_s28, 4  ;;  %s438_s6 = scalar_lea.hbm %s642_s2, 16  ;;  %s433_s12 = int_to_ptr.hbm [resolvable:$true] %s432_s12 }
  0x24   : > { %199 = vst.msk [vmem:[%s190_s26] sm:$0xff] %vm198_vm0, %v197_v2  ;;  %s434_s3 = scalar_lea.hbm %s433_s12, 8  ;;  %p439_p7 = scmp.lt.s32.totalorder %s433_s12, %s642_s2 }
  0x25   : > { %p435_p4 = scmp.ne.s32.totalorder %s433_s12, %s434_s3  ;;  %p440_p8 = scmp.lt.s32.totalorder %s438_s6, %s434_s3 }
  0x27   : > { %p436_p5 = pnand %p435_p4, %p568_p9  ;;  %p441_p10 = por %p440_p8, %p439_p7 }
  0x29   : > { %p437_p6 = pneg %p436_p5 }
  0x2b   : > { %p442_p13 = pnand %p441_p10, %p437_p6 }
  0x2d   : > { %445 = shalt.err (!%p442_p13)
}
  0x2e   : > { %328 = dma.vmem_to_hbm [thread:$0]  (%p568_p9), %s215_s27, 128, %s217_s28, %s201_s21  }
  0x2f PF: > { %s228_s7 = sand.u32 1, %s480_s9   ;;  %p335_p0 = pnand %p316_p12, %p575_p11 }
  0x30   : > { %s229_s16 = scalar_lea.sflag [#allocation4], %s228_s7 }
  0x31   : > { %p336_p1 = pneg %p335_p0 }
  0x33   : > { %475 = dma.done.wait (%p336_p1), %s229_s16, 128  }
  0x34   : > { %477 = vsyncadd (%p336_p1), %s229_s16, 4294967168  ;;  %s18_s14 = sadd.s32 1, %s500_s14   ;;  %s647_s9 = smov %s484_s10 }
  0x35   : > { %p15_p2 = scmp.ge.s32.totalorder %s18_s14, 4   ;;  %s648_s10 = smov %s488_s11 }
  0x36   : > { %s649_s11 = smov %s573_s23  ;;  %s650_s12 = smov %s496_s13 }
  0x37   : > { %s651_s13 = smov %s653_s17  ;;  %17 = sbr.rel (!%p15_p2) target bundleno = 6 (0x6), region = 76 }
  0x3c   :  { %235 = vsyncpa [#allocation3], 1 }
  0x3d   :  { %237 = vsyncpa [#allocation3 + $0x1], 1 }
  0x3e   :  { %238 = vsyncpa [#allocation4], 1 }
  0x3f   :  { %240 = vsyncpa [#allocation4 + $0x1], 1 }

</bundles_post_ra>
